<compile_context>
chip_gen: v7x
topology: tpu7x:2x2x1
jax: 0.10.0
libtpu: 0.0.40
codegen_flags: <defaults>
</compile_context>

<pallas_src>
import jax
import jax.numpy as jnp
from jax.experimental import pallas as pl
from jax.experimental.pallas import tpu as pltpu  # noqa: F401  (TPU backend)

EPSILON = 1e-7  # opt.EPSILON
LANE = 128


def _fused_blend_linear_kernel(x_ref, m_ref, p_ref, w_ref, b_ref, o_ref):
    # x_ref: (B, D)   m_ref: (1, D)   p_ref: (1, D)
    # w_ref: (D, NP)  b_ref: (1, NP)  o_ref: (B, NP)
    #
    # get_raw_mask() / get_raw_pattern() -- EUP tanh computed once per invocation.
    mask = jnp.tanh(m_ref[...]) / (2.0 + EPSILON) + 0.5        # (1, D)
    pattern = jnp.tanh(p_ref[...]) / (2.0 + EPSILON) + 0.5     # (1, D)

    # Trigger blend, broadcast over the batch rows (VPU, lane-dense D=768).
    blended = (1.0 - mask) * x_ref[...] + mask * pattern       # (B, D)

    # Single K=D MXU contraction with the bias folded into the store.
    o_ref[...] = (
        jnp.dot(blended, w_ref[...], preferred_element_type=jnp.float32) + b_ref[...]
    )


def prepare_classifier(w_cls, b_cls):
    """Pad the frozen classifier head once (lane-dense output: NP multiple of 128).

    In Neural Cleanse only mask/pattern are trained; the classifier is frozen, so this
    runs once at setup instead of on every forward.
    """
    D, num_classes = w_cls.shape
    NP = max(LANE, pl.cdiv(num_classes, LANE) * LANE)
    w_pad = jnp.zeros((D, NP), w_cls.dtype).at[:, :num_classes].set(w_cls)
    b_pad = (
        jnp.zeros((1, NP), b_cls.dtype).at[:, :num_classes].set(b_cls.reshape(1, num_classes))
    )
    return w_pad, b_pad, num_classes


def regression_model_forward(x_nchw, mask_tanh, pattern_tanh, w_pad, b_pad, num_classes):
    """x_nchw: (B, C, H, W) f32; mask_tanh: (1, H, W); pattern_tanh: (C, H, W);
    w_pad: (C*H*W, NP) pre-padded; b_pad: (1, NP) pre-padded."""
    B, C, H, W = x_nchw.shape
    HW = H * W
    D, NP = w_pad.shape
    assert D == C * HW

    # Wrapper-side layout plumbing (cheap XLA ops, no extra kernel launches).
    # Channel-major flatten matches PyTorch's NCHW flatten order (c*HW + h*W + w).
    x2 = x_nchw.reshape(B, D)                           # (B, D)
    m2 = jnp.tile(mask_tanh.reshape(1, HW), (1, C))     # mask broadcast over channels
    p2 = pattern_tanh.reshape(1, D)                     # (1, D)

    # Single fused kernel: trigger blend -> one K=D MXU dot -> +bias.
    logits_padded = pl.pallas_call(
        _fused_blend_linear_kernel,
        out_shape=jax.ShapeDtypeStruct((B, NP), jnp.float32),
        in_specs=[
            pl.BlockSpec((B, D), lambda: (0, 0)),
            pl.BlockSpec((1, D), lambda: (0, 0)),
            pl.BlockSpec((1, D), lambda: (0, 0)),
            pl.BlockSpec((D, NP), lambda: (0, 0)),
            pl.BlockSpec((1, NP), lambda: (0, 0)),
        ],
        out_specs=pl.BlockSpec((B, NP), lambda: (0, 0)),
    )(x2, m2, p2, w_pad, b_pad)

    return logits_padded[:, :num_classes]


def _reference(x_nchw, mask_tanh, pattern_tanh, w_cls, b_cls):
    mask = jnp.tanh(mask_tanh) / (2.0 + EPSILON) + 0.5
    pattern = jnp.tanh(pattern_tanh) / (2.0 + EPSILON) + 0.5
    x = (1.0 - mask) * x_nchw + mask * pattern
    B = x.shape[0]
    return x.reshape(B, -1) @ w_cls + b_cls


if __name__ == "__main__":
    B, C, H, W = 2, 3, 16, 16          # CIFAR10-like: 3 channels, small spatial
    NUM_CLASSES = 10
    D = C * H * W

    key = jax.random.PRNGKey(0)
    k_x, k_m, k_p, k_w, k_b = jax.random.split(key, 5)

    x = jax.random.uniform(k_x, (B, C, H, W), dtype=jnp.float32)          # image batch, NCHW
    init_mask = jax.random.normal(k_m, (1, H, W), dtype=jnp.float32)      # nn.Parameter(init_mask)
    init_pattern = jax.random.normal(k_p, (C, H, W), dtype=jnp.float32)   # nn.Parameter(init_pattern)
    w_cls = jax.random.normal(k_w, (D, NUM_CLASSES), dtype=jnp.float32) * 0.02
    b_cls = jax.random.normal(k_b, (1, NUM_CLASSES), dtype=jnp.float32) * 0.01

    # One-time setup (frozen classifier): padded weight/bias hoisted out of the forward.
    w_pad, b_pad, num_classes = prepare_classifier(w_cls, b_cls)
    w_pad, b_pad = jax.block_until_ready((w_pad, b_pad))

    out = regression_model_forward(x, init_mask, init_pattern, w_pad, b_pad, num_classes)
    out = jax.block_until_ready(out)

    ref = _reference(x, init_mask, init_pattern, w_cls, b_cls)
    assert out.shape == (B, NUM_CLASSES)
    assert jnp.allclose(out, ref, atol=1e-4, rtol=1e-4), "mismatch vs reference"

    print("KERNEL_OK")
</pallas_src>

<mosaic_0001>
module attributes {stable_mosaic.version = 11 : i64} {
  func.func @_fused_blend_linear_kernel(%arg0: memref<2x768xf32, #tpu.memory_space<vmem>>, %arg1: memref<1x768xf32, #tpu.memory_space<vmem>>, %arg2: memref<1x768xf32, #tpu.memory_space<vmem>>, %arg3: memref<768x128xf32, #tpu.memory_space<vmem>>, %arg4: memref<1x128xf32, #tpu.memory_space<vmem>>, %arg5: memref<2x128xf32, #tpu.memory_space<vmem>>) attributes {dimension_semantics = [], scalar_prefetch = 0 : i64, scratch_operands = 0 : i64, tpu.core_type = #tpu.core_type<tc>} {
    %c0 = arith.constant 0 : index
    %c0_0 = arith.constant 0 : index
    %0 = vector.load %arg1[%c0, %c0_0] : memref<1x768xf32, #tpu.memory_space<vmem>>, vector<1x768xf32>
    %1 = math.tanh %0 : vector<1x768xf32>
    %cst = arith.constant 2.000000e+00 : f32
    %2 = vector.broadcast %cst : f32 to vector<1x768xf32>
    %3 = arith.divf %1, %2 : vector<1x768xf32>
    %cst_1 = arith.constant 5.000000e-01 : f32
    %4 = vector.broadcast %cst_1 : f32 to vector<1x768xf32>
    %5 = arith.addf %3, %4 : vector<1x768xf32>
    %c0_2 = arith.constant 0 : index
    %c0_3 = arith.constant 0 : index
    %6 = vector.load %arg2[%c0_2, %c0_3] : memref<1x768xf32, #tpu.memory_space<vmem>>, vector<1x768xf32>
    %7 = math.tanh %6 : vector<1x768xf32>
    %cst_4 = arith.constant 2.000000e+00 : f32
    %8 = vector.broadcast %cst_4 : f32 to vector<1x768xf32>
    %9 = arith.divf %7, %8 : vector<1x768xf32>
    %cst_5 = arith.constant 5.000000e-01 : f32
    %10 = vector.broadcast %cst_5 : f32 to vector<1x768xf32>
    %11 = arith.addf %9, %10 : vector<1x768xf32>
    %cst_6 = arith.constant 1.000000e+00 : f32
    %12 = vector.broadcast %cst_6 : f32 to vector<1x768xf32>
    %13 = arith.subf %12, %5 : vector<1x768xf32>
    %c0_7 = arith.constant 0 : index
    %c0_8 = arith.constant 0 : index
    %14 = vector.load %arg0[%c0_7, %c0_8] : memref<2x768xf32, #tpu.memory_space<vmem>>, vector<2x768xf32>
    %15 = vector.broadcast %13 : vector<1x768xf32> to vector<2x768xf32>
    %16 = arith.mulf %15, %14 : vector<2x768xf32>
    %17 = arith.mulf %5, %11 : vector<1x768xf32>
    %18 = vector.broadcast %17 : vector<1x768xf32> to vector<2x768xf32>
    %19 = arith.addf %16, %18 : vector<2x768xf32>
    %c0_9 = arith.constant 0 : index
    %c0_10 = arith.constant 0 : index
    %20 = vector.load %arg3[%c0_9, %c0_10] : memref<768x128xf32, #tpu.memory_space<vmem>>, vector<768x128xf32>
    %cst_11 = arith.constant dense<0.000000e+00> : vector<2x128xf32>
    %21 = tpu.matmul %19, %20, %cst_11 {dimension_numbers = #tpu.dot_dimension_numbers<[1], [0], [0], [1], [0, 0, 1, 1], [], []>} : vector<2x768xf32>, vector<768x128xf32>, vector<2x128xf32> -> vector<2x128xf32>
    %c0_12 = arith.constant 0 : index
    %c0_13 = arith.constant 0 : index
    %22 = vector.load %arg4[%c0_12, %c0_13] : memref<1x128xf32, #tpu.memory_space<vmem>>, vector<1x128xf32>
    %23 = vector.broadcast %22 : vector<1x128xf32> to vector<2x128xf32>
    %24 = arith.addf %21, %23 : vector<2x128xf32>
    %c0_14 = arith.constant 0 : index
    %c0_15 = arith.constant 0 : index
    %25 = vector.load %arg5[%c0_14, %c0_15] : memref<2x128xf32, #tpu.memory_space<vmem>>, vector<2x128xf32>
    tpu.vector_store %arg5[%c0_14, %c0_15], %24 {strides = array<i32>} : memref<2x128xf32, #tpu.memory_space<vmem>>, vector<2x128xf32>,
    return
  }
}

</mosaic_0001>

<bundles_post_ra>
// kernel: tpu_custom_call.1
= control target key start
LH: loop header
LB: loop body
LE: loop exit
PB: predicated region body
PF: predicated region fallthrough
CT: control target
= control target key end

     0   :  { %10 = vsyncpa [#allocation3], 0  ;;  %s938_s0 = inlined_call_operand.hbm [shape: f32[2,768], index: 0, kind: input, shape index: {}]   ;;  %s939_s1 = inlined_call_operand.hbm [shape: f32[1,768], index: 1, kind: input, shape index: {}]   ;;  %s940_s2 = inlined_call_operand.vmem [shape: f32[1,768], index: 2, kind: input, shape index: {}]   ;;  %s941_s3 = inlined_call_operand.hbm [shape: f32[768,128], index: 3, kind: input, shape index: {}]   ;;  %s942_s4 = inlined_call_operand.vmem [shape: f32[1,128], index: 4, kind: input, shape index: {}]   ;;  %s943_s5 = inlined_call_operand.hbm [shape: f32[2,128], index: 5, kind: output, shape index: {}]  }
   0x1   :  { %11 = vsyncpa [#allocation6], 0 }
   0x2   :  { %12 = vsyncpa [#allocation4], 0  ;;  %s817_s18 = smov [#allocation5]   ;;  %s818_s20 = smov [#allocation2]  }
   0x3   :  { %s29_s19 = sshll.u32 %s817_s18, 4  ;;  %s19_s21 = sshll.u32 %s818_s20, 4  ;;  %s30_s19 = int_to_ptr.vmem [resolvable:$true] %s29_s19  ;;  %s20_s21 = int_to_ptr.vmem [resolvable:$true] %s19_s21 }
   0x4   :  { %s723_s24 = scalar_lea.hbm %s939_s1, 96 }
   0x5   :  { %p724_p0 = scmp.ne.s32.totalorder %s939_s1, %s723_s24  ;;  %p727_p1 = scmp.lt.u32.totalorder %s723_s24, %s939_s1 }
   0x7   :  { %p729_p2 = pnand %p727_p1, %p724_p0 }
   0x9   :  { %732 = shalt.err (!%p729_p2)
}
   0xa   :  { %s733_s29 = scalar_lea.vmem %s30_s19, 96  ;;  %p738_p4 = scmp.lt.s32.totalorder %s30_s19, %s30_s19 }
   0xb   :  { %p734_p3 = scmp.ne.s32.totalorder %s30_s19, %s733_s29  ;;  %p739_p5 = scmp.lt.s32.totalorder %s733_s29, %s733_s29 }
   0xd   :  { %p740_p6 = por %p739_p5, %p738_p4 }
   0xf   :  { %p741_p7 = pnand %p740_p6, %p734_p3 }
  0x11   :  { %744 = shalt.err (!%p741_p7)
}
  0x12   :  { %32 = dma.hbm_to_vmem [thread:$0]  %s939_s1, 96, %s30_s19, [#allocation6]  }
  0x13   :  { %s745_s9 = scalar_lea.hbm %s938_s0, 192 }
  0x14   :  { %p746_p8 = scmp.ne.s32.totalorder %s938_s0, %s745_s9  ;;  %p749_p9 = scmp.lt.u32.totalorder %s745_s9, %s938_s0 }
  0x16   :  { %p751_p10 = pnand %p749_p9, %p746_p8 }
  0x18   :  { %754 = shalt.err (!%p751_p10)
}
  0x19   :  { %s755_s14 = scalar_lea.vmem %s20_s21, 192  ;;  %p760_p12 = scmp.lt.s32.totalorder %s20_s21, %s20_s21 }
  0x1a   :  { %p756_p11 = scmp.ne.s32.totalorder %s20_s21, %s755_s14  ;;  %p761_p13 = scmp.lt.s32.totalorder %s755_s14, %s755_s14 }
  0x1c   :  { %p762_p0 = por %p761_p13, %p760_p12 }
  0x1e   :  { %p763_p1 = pnand %p762_p0, %p756_p11 }
  0x20   :  { %766 = shalt.err (!%p763_p1)
}
  0x21   :  { %22 = dma.hbm_to_vmem [thread:$0]  %s938_s0, 192, %s20_s21, [#allocation3]  }
  0x22   :  { %s819_s16 = smov [#allocation7]   ;;  %s767_s20 = scalar_lea.hbm %s941_s3, 12288 }
  0x23   :  { %s40_s17 = sshll.u32 %s819_s16, 4  ;;  %p768_p2 = scmp.ne.s32.totalorder %s941_s3, %s767_s20  ;;  %s41_s17 = int_to_ptr.vmem [resolvable:$true] %s40_s17 }
  0x24   :  { %p771_p3 = scmp.lt.u32.totalorder %s767_s20, %s941_s3 }
  0x26   :  { %p773_p4 = pnand %p771_p3, %p768_p2 }
  0x28   :  { %776 = shalt.err (!%p773_p4)
}
  0x29   :  { %s777_s26 = scalar_lea.vmem %s41_s17, 12288  ;;  %p782_p6 = scmp.lt.s32.totalorder %s41_s17, %s41_s17 }
  0x2a   :  { %p778_p5 = scmp.ne.s32.totalorder %s41_s17, %s777_s26  ;;  %p783_p7 = scmp.lt.s32.totalorder %s777_s26, %s777_s26 }
  0x2c   :  { %p784_p8 = por %p783_p7, %p782_p6 }
  0x2e   :  { %p785_p9 = pnand %p784_p8, %p778_p5 }
  0x30   :  { %788 = shalt.err (!%p785_p9)
}
  0x31   :  { %s820_s0 = smov 128   ;;  %s821_s21 = smov 8  }
  0x32   :  { %46 = dma.hbm_to_vmem [thread:$0]  %s941_s3, 12288, %s41_s17, [#allocation6], %s820_s0, %s820_s0, %s821_s21  }
  0x33   :  { %811 = dma.done.wait [#allocation3], 192  }
  0x34   :  { %812 = vsyncadd [#allocation3], 4294967104 }
  0x35   :  { %813 = dma.done.wait [#allocation6], 12384  }
  0x36   :  { %814 = vsyncadd [#allocation6], 4294954912  ;;  %v194_v0 = vld [vmem:[#allocation7 + $0x80] sm:$0xff]  ;;  %v195_v1 = vld [vmem:[#allocation7 + $0x88] sm:$0xff]  ;;  %s823_s6 = smov [#allocation8]  }
  0x37   :  { %v178_v2 = vld [vmem:[#allocation7] sm:$0xff]  ;;  %v615_v3 = vpack.c.bf16 %v195_v1, %v194_v0  ;;  %v179_v4 = vld [vmem:[#allocation7 + $0x8] sm:$0xff]  ;;  %v196_v11 = vld [vmem:[#allocation7 + $0x90] sm:$0xff]  ;;  %s498_s7 = sshll.u32 %s823_s6, 4  ;;  %s499_s7 = int_to_ptr.vmem [resolvable:$true] %s498_s7 }
  0x38   :  { %v226_v5 = vld [vmem:[#allocation7 + $0x180] sm:$0xff]  ;;  %v227_v6 = vld [vmem:[#allocation7 + $0x188] sm:$0xff]  ;;  %v617_v7 = vpack.c.bf16 %v179_v4, %v178_v2  ;;  %v197_v13 = vld [vmem:[#allocation7 + $0x98] sm:$0xff]  ;;  %s789_s8 = scalar_lea.vmem %s499_s7, 32  ;;  %p794_p11 = scmp.lt.s32.totalorder %s499_s7, %s499_s7 }
  0x39   :  { %v647_v8 = vpack.c.bf16 %v227_v6, %v226_v5  ;;  %v210_v9 = vld [vmem:[#allocation7 + $0x100] sm:$0xff]  ;;  %v211_v10 = vld [vmem:[#allocation7 + $0x108] sm:$0xff]  ;;  %616 = vmatprep.subr.bf16.mxu0 %v615_v3  ;;  %v180_v14 = vld [vmem:[#allocation7 + $0x10] sm:$0xff]  ;;  %v619_v16 = vpack.c.bf16 %v197_v13, %v196_v11  ;;  %v71_v13 = vlaneseq  ;;  %p790_p10 = scmp.ne.s32.totalorder %s499_s7, %s789_s8  ;;  %p795_p12 = scmp.lt.s32.totalorder %s789_s8, %s789_s8 }
  0x3a   :  { %v649_v12 = vpack.c.bf16 %v211_v10, %v210_v9  ;;  %v181_v15 = vld [vmem:[#allocation7 + $0x18] sm:$0xff]  ;;  %618 = vmatpush3.bf16.msra.mxu0 %v617_v7  ;;  %v228_v18 = vld [vmem:[#allocation7 + $0x190] sm:$0xff]  ;;  %v198_v23 = vld [vmem:[#allocation7 + $0xa0] sm:$0xff] }
  0x3b   :  { %648 = vmatprep.subr.bf16.mxu1 %v647_v8  ;;  %v621_v17 = vpack.c.bf16 %v181_v15, %v180_v14  ;;  %v229_v19 = vld [vmem:[#allocation7 + $0x198] sm:$0xff]  ;;  %v212_v20 = vld [vmem:[#allocation7 + $0x110] sm:$0xff]  ;;  %v199_v24 = vld [vmem:[#allocation7 + $0xa8] sm:$0xff]  ;;  %620 = vmatprep.subr.bf16.mxu0 %v619_v16  ;;  %v822_v14 = vmov 1983009808   ;;  %p796_p13 = por %p795_p12, %p794_p11 }
  0x3c   :  { %650 = vmatpush3.bf16.msra.mxu1 %v649_v12  ;;  %v651_v21 = vpack.c.bf16 %v229_v19, %v228_v18  ;;  %v213_v22 = vld [vmem:[#allocation7 + $0x118] sm:$0xff]  ;;  %v623_v26 = vpack.c.bf16 %v199_v24, %v198_v23  ;;  %v182_v27 = vld [vmem:[#allocation7 + $0x20] sm:$0xff]  ;;  %v183_v28 = vld [vmem:[#allocation7 + $0x28] sm:$0xff]  ;;  %v105_v15 = vunpack.c.l.s4 %v822_v14 }
  0x3d   :  { %v653_v25 = vpack.c.bf16 %v213_v22, %v212_v20  ;;  %v230_v29 = vld [vmem:[#allocation7 + $0x1a0] sm:$0xff]  ;;  %v231_v30 = vld [vmem:[#allocation7 + $0x1a8] sm:$0xff]  ;;  %v625_v33 = vpack.c.bf16 %v183_v28, %v182_v27  ;;  %v200_v35 = vld [vmem:[#allocation7 + $0xb0] sm:$0xff]  ;;  %p797_p0 = pnand %p796_p13, %p790_p10 }
  0x3e   :  { %652 = vmatprep.subr.bf16.mxu1 %v651_v21  ;;  %v214_v31 = vld [vmem:[#allocation7 + $0x120] sm:$0xff]  ;;  %v215_v32 = vld [vmem:[#allocation7 + $0x128] sm:$0xff]  ;;  %622 = vmatpush3.bf16.msra.mxu0 %v621_v17  ;;  %v655_v34 = vpack.c.bf16 %v231_v30, %v230_v29  ;;  %v201_v36 = vld [vmem:[#allocation7 + $0xb8] sm:$0xff]  ;;  %v893_v29 = vshrl.u32 %v71_v13, 7  ;;  %v106_v30 = vunpack.c.0.s8 %v105_v15 }
  0x3f   :  { %v184_v37 = vld [vmem:[#allocation7 + $0x30] sm:$0xff]  ;;  %624 = vmatprep.subr.bf16.mxu0 %v623_v26  ;;  %v657_v38 = vpack.c.bf16 %v215_v32, %v214_v31  ;;  %v627_v39 = vpack.c.bf16 %v201_v36, %v200_v35  ;;  %v185_v40 = vld [vmem:[#allocation7 + $0x38] sm:$0xff]  ;;  %v202_v46 = vld [vmem:[#allocation7 + $0xc0] sm:$0xff] }
  0x40   :  { %654 = vmatpush3.bf16.msra.mxu1 %v653_v25  ;;  %v232_v41 = vld [vmem:[#allocation7 + $0x1b0] sm:$0xff]  ;;  %v233_v42 = vld [vmem:[#allocation7 + $0x1b8] sm:$0xff]  ;;  %v203_v47 = vld [vmem:[#allocation7 + $0xc8] sm:$0xff]  ;;  %v629_v48 = vpack.c.bf16 %v185_v40, %v184_v37 }
  0x41   :  { %656 = vmatprep.subr.bf16.mxu1 %v655_v34  ;;  %v659_v43 = vpack.c.bf16 %v233_v42, %v232_v41  ;;  %v216_v44 = vld [vmem:[#allocation7 + $0x130] sm:$0xff]  ;;  %v217_v45 = vld [vmem:[#allocation7 + $0x138] sm:$0xff]  ;;  %v234_v49 = vld [vmem:[#allocation7 + $0x1c0] sm:$0xff]  ;;  %v631_v52 = vpack.c.bf16 %v203_v47, %v202_v46  ;;  %v109_v41 = vsub.s32 %v106_v30, %v893_v29 }
  0x42   :  { %626 = vmatpush3.bf16.msra.mxu0 %v625_v33  ;;  %v235_v50 = vld [vmem:[#allocation7 + $0x1c8] sm:$0xff]  ;;  %v661_v51 = vpack.c.bf16 %v217_v45, %v216_v44  ;;  %v186_v53 = vld [vmem:[#allocation7 + $0x40] sm:$0xff]  ;;  %v204_v58 = vld [vmem:[#allocation7 + $0xd0] sm:$0xff] }
  0x43   :  { %628 = vmatprep.subr.bf16.mxu0 %v627_v39  ;;  %v187_v54 = vld [vmem:[#allocation7 + $0x48] sm:$0xff]  ;;  %v218_v55 = vld [vmem:[#allocation7 + $0x140] sm:$0xff]  ;;  %v663_v56 = vpack.c.bf16 %v235_v50, %v234_v49  ;;  %v205_v59 = vld [vmem:[#allocation7 + $0xd8] sm:$0xff] }
  0x44   :  { %658 = vmatpush3.bf16.msra.mxu1 %v657_v38  ;;  %v219_v57 = vld [vmem:[#allocation7 + $0x148] sm:$0xff]  ;;  %v236_v60 = vld [vmem:[#allocation7 + $0x1d0] sm:$0xff]  ;;  %v237_v61 = vld [vmem:[#allocation7 + $0x1d8] sm:$0xff]  ;;  %v633_v62 = vpack.c.bf16 %v187_v54, %v186_v53  ;;  %v635_v0 = vpack.c.bf16 %v205_v59, %v204_v58  ;;  %v85_v53 = vsub.s32 3, %v893_v29 }
  0x45   :  { %660 = vmatprep.subr.bf16.mxu1 %v659_v43  ;;  %v665_v63 = vpack.c.bf16 %v219_v57, %v218_v55  ;;  %v188_v1 = vld [vmem:[#allocation7 + $0x50] sm:$0xff]  ;;  %v189_v2 = vld [vmem:[#allocation7 + $0x58] sm:$0xff]  ;;  %v667_v4 = vpack.c.bf16 %v237_v61, %v236_v60  ;;  %v206_v6 = vld [vmem:[#allocation7 + $0xe0] sm:$0xff]  ;;  %v81_v55 = vsub.s32 2, %v893_v29 }
  0x46   :  { %630 = vmatpush3.bf16.msra.mxu0 %v629_v48  ;;  %v220_v3 = vld [vmem:[#allocation7 + $0x150] sm:$0xff]  ;;  %v221_v5 = vld [vmem:[#allocation7 + $0x158] sm:$0xff]  ;;  %v207_v7 = vld [vmem:[#allocation7 + $0xe8] sm:$0xff]  ;;  %v637_v10 = vpack.c.bf16 %v189_v2, %v188_v1 }
  0x47   :  { %632 = vmatprep.subr.bf16.mxu0 %v631_v52  ;;  %v238_v8 = vld [vmem:[#allocation7 + $0x1e0] sm:$0xff]  ;;  %v239_v9 = vld [vmem:[#allocation7 + $0x1e8] sm:$0xff]  ;;  %v58_v12 = vld [vmem:[#allocation5] sm:$0x3f]  ;;  %v669_v16 = vpack.c.bf16 %v221_v5, %v220_v3  ;;  %v639_v17 = vpack.c.bf16 %v207_v7, %v206_v6  ;;  %v73_v52 = vsub.s32 0, %v893_v29 }
  0x48   :  { %662 = vmatpush3.bf16.msra.mxu1 %v661_v51  ;;  %v190_v11 = vld [vmem:[#allocation7 + $0x60] sm:$0xff]  ;;  %v191_v18 = vld [vmem:[#allocation7 + $0x68] sm:$0xff]  ;;  %719 = vtanh.f32 %v58_v12  ;;  %v671_v21 = vpack.c.bf16 %v239_v9, %v238_v8  ;;  %v208_v23 = vld [vmem:[#allocation7 + $0xf0] sm:$0xff]  ;;  %v77_v51 = vsub.s32 1, %v893_v29 }
  0x49   :  { %664 = vmatprep.subr.bf16.mxu1 %v663_v56  ;;  %v222_v19 = vld [vmem:[#allocation7 + $0x160] sm:$0xff]  ;;  %v63_v20 = vld [vmem:[%s940_s2] sm:$0x3f]  ;;  %v209_v24 = vld [vmem:[#allocation7 + $0xf8] sm:$0xff]  ;;  %v641_v27 = vpack.c.bf16 %v191_v18, %v190_v11 }
  0x4a   :  { %634 = vmatpush3.bf16.msra.mxu0 %v633_v62  ;;  %v223_v22 = vld [vmem:[#allocation7 + $0x168] sm:$0xff]  ;;  %721 = vtanh.f32 %v63_v20  ;;  %v240_v25 = vld [vmem:[#allocation7 + $0x1f0] sm:$0xff]  ;;  %v241_v26 = vld [vmem:[#allocation7 + $0x1f8] sm:$0xff]  ;;  %v643_v32 = vpack.c.bf16 %v209_v24, %v208_v23  ;;  %v93_v62 = vsub.s32 5, %v893_v29 }
  0x4b   :  { %636 = vmatprep.subr.bf16.mxu0 %v635_v0  ;;  %v192_v28 = vld [vmem:[#allocation7 + $0x70] sm:$0xff]  ;;  %v673_v31 = vpack.c.bf16 %v223_v22, %v222_v19  ;;  %v193_v33 = vld [vmem:[#allocation7 + $0x78] sm:$0xff]  ;;  %v675_v36 = vpack.c.bf16 %v241_v26, %v240_v25  ;;  %v258_v38 = vld [vmem:[#allocation7 + $0x280] sm:$0xff] }
  0x4c   :  { %666 = vmatpush3.bf16.msra.mxu1 %v665_v63  ;;  %v68_v34 = vld [vmem:[#allocation2] sm:$0xff]  ;;  %v225_v37 = vld [vmem:[#allocation7 + $0x178] sm:$0xff]  ;;  %v645_v40 = vpack.c.bf16 %v193_v33, %v192_v28  ;;  %v242_v3 = vld [vmem:[#allocation7 + $0x200] sm:$0xff] }
  0x4d   :  { %668 = vmatprep.subr.bf16.mxu1 %v667_v4  ;;  %v224_v35 = vld [vmem:[#allocation7 + $0x170] sm:$0xff]  ;;  %v259_v39 = vld [vmem:[#allocation7 + $0x288] sm:$0xff]  ;;  %v103_v42 = vcombine.high %v68_v34, %v68_v34  ;;  %v110_v48 = vrot.slane %v68_v34, %v109_v41  ;;  %v261_v15 = vld [vmem:[#allocation7 + $0x298] sm:$0xff] }
  0x4e   :  { %638 = vmatpush3.bf16.msra.mxu0 %v637_v10  ;;  %v677_v43 = vpack.c.bf16 %v225_v37, %v224_v35  ;;  %v679_v44 = vpack.c.bf16 %v259_v39, %v258_v38  ;;  %v900_v56 = vld.sshfl [vmem:[#allocation2 + $0x8] sm:$0x33 pattern:$0x76325410]  ;;  %v243_v4 = vld [vmem:[#allocation7 + $0x208] sm:$0xff]  ;;  %v246_v33 = vld [vmem:[#allocation7 + $0x220] sm:$0xff] }
  0x4f   :  { %640 = vmatprep.subr.bf16.mxu0 %v639_v17  ;;  %v117_v49 = vrot.slane %v103_v42, %v109_v41  ;;  %v118_v59 = vcombine.high %v110_v48, %v110_v48  ;;  %v127_v63 = vcombine.high %v900_v56, %v900_v56  ;;  %v260_v14 = vld [vmem:[#allocation7 + $0x290] sm:$0xff]  ;;  %v245_v25 = vld [vmem:[#allocation7 + $0x218] sm:$0xff]  ;;  %v263_v28 = vld [vmem:[#allocation7 + $0x2a8] sm:$0xff] }
  0x50   :  { %670 = vmatpush3.bf16.msra.mxu1 %v669_v16  ;;  %v681_v16 = vpack.c.bf16 %v243_v4, %v242_v3  ;;  %v683_v23 = vpack.c.bf16 %v261_v15, %v260_v14  ;;  %v244_v24 = vld [vmem:[#allocation7 + $0x210] sm:$0xff]  ;;  %v247_v34 = vld [vmem:[#allocation7 + $0x228] sm:$0xff]  ;;  %v266_v41 = vld [vmem:[#allocation7 + $0x2c0] sm:$0xff] }
  0x51   :  { %672 = vmatprep.subr.bf16.mxu1 %v671_v21  ;;  %v119_v60 = vcombine.high %v117_v49, %v117_v49  ;;  %v264_v35 = vld [vmem:[#allocation7 + $0x2b0] sm:$0xff]  ;;  %v689_v37 = vpack.c.bf16 %v247_v34, %v246_v33  ;;  %v267_v42 = vld [vmem:[#allocation7 + $0x2c8] sm:$0xff] }
  0x52   :  { %642 = vmatpush3.bf16.msra.mxu0 %v641_v27  ;;  %v720_v45 = vpop.eup %719  ;;  %v262_v27 = vld [vmem:[#allocation7 + $0x2a0] sm:$0xff]  ;;  %v248_v39 = vld [vmem:[#allocation7 + $0x230] sm:$0xff] }
  0x53   :  { %644 = vmatprep.subr.bf16.mxu0 %v643_v32  ;;  %v61_v47 = vmul.f32 0.5, %v720_v45  ;;  %v687_v32 = vpack.c.bf16 %v263_v28, %v262_v27  ;;  %v250_v45 = vld [vmem:[#allocation7 + $0x240] sm:$0xff]  ;;  %v256_v4 = vld [vmem:[#allocation7 + $0x270] sm:$0xff] }
  0x54   :  { %674 = vmatpush3.bf16.msra.mxu1 %v673_v31  ;;  %v722_v46 = vpop.eup %721  ;;  %v685_v31 = vpack.c.bf16 %v245_v25, %v244_v24 }
  0x55   :  { %676 = vmatprep.subr.bf16.mxu1 %v675_v36  ;;  %v65_v50 = vmul.f32 0.5, %v722_v46  ;;  %v62_v54 = vadd.f32 0.5, %v61_v47  ;;  %v265_v36 = vld [vmem:[#allocation7 + $0x2b8] sm:$0xff]  ;;  %v251_v46 = vld [vmem:[#allocation7 + $0x248] sm:$0xff]  ;;  %v268_v47 = vld [vmem:[#allocation7 + $0x2d0] sm:$0xff] }
  0x56   :  { %646 = vmatpush3.bf16.msra.mxu0 %v645_v40  ;;  %v691_v38 = vpack.c.bf16 %v265_v36, %v264_v35  ;;  %v249_v40 = vld [vmem:[#allocation7 + $0x238] sm:$0xff] }
  0x57   :  { %680 = vmatprep.subr.bf16.mxu0 %v679_v44  ;;  %v66_v57 = vadd.f32 0.5, %v65_v50  ;;  %v902_v58 = vsub.f32 1.0, %v62_v54  ;;  %v695_v44 = vpack.c.bf16 %v267_v42, %v266_v41 }
  0x58   :  { %678 = vmatpush3.bf16.msra.mxu1 %v677_v43  ;;  %v693_v43 = vpack.c.bf16 %v249_v40, %v248_v39 }
  0x59   :  { %v904_v61 = vmul.f32 %v66_v57, %v62_v54  ;;  %v78_v0 = vrot.slane %v902_v58, %v77_v51  ;;  %v74_v1 = vrot.slane %v902_v58, %v73_v52  ;;  %v86_v2 = vrot.slane %v902_v58, %v85_v53  ;;  %v271_v54 = vld [vmem:[#allocation7 + $0x2e8] sm:$0xff] }
  0x5a   :  { %v82_v5 = vrot.slane %v902_v58, %v81_v55  ;;  %v94_v17 = vrot.slane %v902_v58, %v93_v62 }
  0x5b   :  { %v149_v6 = vrot.slane %v904_v61, %v77_v51  ;;  %v145_v7 = vrot.slane %v904_v61, %v73_v52  ;;  %v157_v8 = vrot.slane %v904_v61, %v85_v53  ;;  %v153_v9 = vrot.slane %v904_v61, %v81_v55  ;;  %v252_v51 = vld [vmem:[#allocation7 + $0x250] sm:$0xff]  ;;  %v253_v52 = vld [vmem:[#allocation7 + $0x258] sm:$0xff]  ;;  %v270_v53 = vld [vmem:[#allocation7 + $0x2e0] sm:$0xff] }
  0x5c   :  { %v135_v10 = vmul.f32 %v118_v59, %v78_v0  ;;  %v134_v11 = vmul.f32 %v110_v48, %v74_v1  ;;  %v137_v12 = vmul.f32 %v119_v60, %v86_v2  ;;  %v136_v13 = vmul.f32 %v117_v49, %v82_v5  ;;  %v269_v48 = vld [vmem:[#allocation7 + $0x2d8] sm:$0xff]  ;;  %v254_v60 = vld [vmem:[#allocation7 + $0x260] sm:$0xff] }
  0x5d   :  { %v165_v18 = vrot.slane %v904_v61, %v93_v62  ;;  %v139_v26 = vmul.f32 %v127_v63, %v94_v17  ;;  %v697_v49 = vpack.c.bf16 %v251_v46, %v250_v45  ;;  %v699_v50 = vpack.c.bf16 %v269_v48, %v268_v47  ;;  %v255_v62 = vld [vmem:[#allocation7 + $0x268] sm:$0xff]  ;;  %v272_v63 = vld [vmem:[#allocation7 + $0x2f0] sm:$0xff]  ;;  %v273_v0 = vld [vmem:[#allocation7 + $0x2f8] sm:$0xff] }
  0x5e   :  { %v173_v19 = vadd.f32 %v149_v6, %v135_v10  ;;  %v172_v20 = vadd.f32 %v145_v7, %v134_v11  ;;  %v175_v21 = vadd.f32 %v157_v8, %v137_v12  ;;  %v174_v22 = vadd.f32 %v153_v9, %v136_v13  ;;  %v257_v5 = vld [vmem:[#allocation7 + $0x278] sm:$0xff] }
  0x5f   :  { %v177_v30 = vadd.f32 %v165_v18, %v139_v26  ;;  %v89_v55 = vsub.s32 4, %v893_v29  ;;  %v701_v57 = vpack.c.bf16 %v253_v52, %v252_v51  ;;  %v703_v59 = vpack.c.bf16 %v271_v54, %v270_v53 }
  0x60   :  { %345 = vmatprep.mubr.f32.mxu0 %v173_v19  ;;  %415 = vmatprep.mubr.f32.mxu1 %v175_v21  ;;  %v705_v2 = vpack.c.bf16 %v255_v62, %v254_v60  ;;  %v707_v3 = vpack.c.bf16 %v273_v0, %v272_v63  ;;  %v709_v7 = vpack.c.bf16 %v257_v5, %v256_v4 }
  0x61   :  { %346 = vmatmul.mubr.f32.vlgmr.msra.gmra.mrb[0].mxu0 %v172_v20  ;;  %416 = vmatmul.mubr.f32.vlgmr.msra.gmra.mrb[0].mxu1 %v174_v22  ;;  %v90_v1 = vrot.slane %v902_v58, %v89_v55  ;;  %v161_v29 = vrot.slane %v904_v61, %v89_v55  ;;  %v509_v58 = vld [vmem:[%s942_s4] ss:$0 sm:$0xff] }
  0x62   :  { %682 = vmatpush3.bf16.msra.mxu0 %v681_v16  ;;  %485 = vmatprep.mubr.f32.mxu0 %v177_v30 }
  0x63   :  { %684 = vmatprep.subr.bf16.mxu0 %v683_v23  ;;  %v138_v6 = vmul.f32 %v900_v56, %v90_v1 }
  0x65   :  { %v176_v8 = vadd.f32 %v161_v29, %v138_v6 }
  0x66   :  { %686 = vmatpush3.bf16.msra.mxu0 %v685_v31 }
  0x67   :  { %688 = vmatprep.subr.bf16.mxu0 %v687_v32 }
  0x6a   :  { %690 = vmatpush3.bf16.msra.mxu0 %v689_v37 }
  0x6b   :  { %692 = vmatprep.subr.bf16.mxu0 %v691_v38 }
  0x6e   :  { %694 = vmatpush3.bf16.msra.mxu0 %v693_v43 }
  0x6f   :  { %696 = vmatprep.subr.bf16.mxu0 %v695_v44 }
  0x72   :  { %698 = vmatpush3.bf16.msra.mxu0 %v697_v49 }
  0x73   :  { %700 = vmatprep.subr.bf16.mxu0 %v699_v50 }
  0x76   :  { %702 = vmatpush3.bf16.msra.mxu0 %v701_v57 }
  0x77   :  { %704 = vmatprep.subr.bf16.mxu0 %v703_v59 }
  0x7a   :  { %706 = vmatpush3.bf16.msra.mxu0 %v705_v2 }
  0x7b   :  { %708 = vmatprep.subr.bf16.mxu0 %v707_v3 }
  0x7e   :  { %710 = vmatpush3.bf16.msra.mxu0 %v709_v7 }
  0x81   :  { %486 = vmatmul.mubr.f32.vlgmr.msra.gmra.mrb[2].mxu0 %v176_v8 }
 0x134   :  { %v542_v9 = vpop.f32.mrb[0].mxu0  ;;  %v577_v10 = vpop.f32.mrb[0].mxu1 }
 0x135   :  { %v543_v11 = vpop.f32.mrb[1].mxu0  ;;  %v578_v12 = vpop.f32.mrb[1].mxu1 }
 0x136   :  { %v544_v13 = vadd.f32 %v543_v11, %v542_v9  ;;  %v579_v14 = vadd.f32 %v578_v12, %v577_v10 }
 0x138   :  { %v348_v15 = vadd.f32 %v544_v13, %v509_v58 }
 0x13a   :  { %v418_v56 = vadd.f32 %v579_v14, %v348_v15 }
 0x154   :  { %v612_v16 = vpop.f32.mrb[2].mxu0 }
 0x155   :  { %v613_v61 = vpop.f32.mrb[3].mxu0 }
 0x156   :  { %v614_v17 = vadd.f32 %v613_v61, %v612_v16 }
 0x158   :  { %v488_v18 = vadd.f32 %v614_v17, %v418_v56 }
 0x15a   :  { %491 = vst [vmem:[#allocation8] sm:$0x3] %v488_v18 }
 0x15b   :  { %800 = shalt.err (!%p797_p0)
}
 0x15c   :  { %s801_s10 = scalar_lea.hbm %s943_s5, 32 }
 0x15d   :  { %p802_p1 = scmp.ne.s32.totalorder %s943_s5, %s801_s10  ;;  %p805_p2 = scmp.lt.u32.totalorder %s801_s10, %s943_s5 }
 0x15f   :  { %p807_p3 = pnand %p805_p2, %p802_p1 }
 0x161   :  { %810 = shalt.err (!%p807_p3)
}
 0x162   :  { %501 = dma.vmem_to_hbm [thread:$0]  %s499_s7, 32, %s943_s5, [#allocation4]  }
 0x163   :  { %815 = dma.done.wait [#allocation4], 32  }
 0x164   :  { %816 = vsyncadd [#allocation4], 4294967264 }
 0x165   :  { %505 = vsyncpa [#allocation3], 1 }
 0x166   :  { %506 = vsyncpa [#allocation6], 1 }
 0x167   :  { %507 = vsyncpa [#allocation4], 1 }

</bundles_post_ra>
